<compile_context>
chip_gen: v5e
topology: v5e:2x2
jax: 0.10.0
libtpu: 0.0.40
codegen_flags: <defaults>
</compile_context>

<pallas_src>
import math

import jax
import jax.numpy as jnp
from jax import lax
from jax.experimental import pallas as pl
from jax.experimental.pallas import tpu as pltpu

_NEG_BIG = -1e30  # softmax mask value (finite: avoids inf-inf NaNs)


def _round_up(x, m):
    return ((x + m - 1) // m) * m


def _nbytes(shape, dtype):
    n = 1
    for s in shape:
        n *= s
    return n * jnp.dtype(dtype).itemsize


def _make_kernel(inv_temperature, n_pad_cols):
    """inv_temperature, n_pad_cols are Python constants baked at trace time."""

    def kernel(emb_ref, fc_ref, w_ref, ws2_ref,
               logits_ref, wsig_ref, lse_ref,
               m_sc, l_sc):
        n = pl.program_id(1)
        num_n = pl.num_programs(1)

        # ---- per batch tile init of the online-logsumexp state ----
        @pl.when(n == 0)
        def _():
            m_sc[...] = jnp.full_like(m_sc, _NEG_BIG)
            l_sc[...] = jnp.zeros_like(l_sc)

        # ---- logits tile: emb @ norm_w[n-tile].T (weights pre-normalized &
        #      pre-cast in the wrapper; contraction on last dims -> no transpose)
        logits = lax.dot_general(
            emb_ref[...], w_ref[...], (((1,), (1,)), ((), ())),
            preferred_element_type=jnp.float32)               # (TB, TN) f32
        logits_ref[...] = logits.astype(logits_ref.dtype)

        # ---- w_sigma tile: sigmoid(fc @ ws2[n-tile].T); fc hoisted to wrapper
        fc2 = lax.dot_general(
            fc_ref[...], ws2_ref[...], (((1,), (1,)), ((), ())),
            preferred_element_type=jnp.float32)               # (TB, TN) f32
        wsig_ref[...] = jax.nn.sigmoid(fc2).astype(wsig_ref.dtype)

        # ---- online logsumexp of temperature-scaled logits across class tiles
        scaled = logits * inv_temperature

        def accumulate(s):
            m_prev = m_sc[...]
            m_new = jnp.maximum(m_prev, jnp.max(s, axis=1, keepdims=True))
            l_sc[...] = (l_sc[...] * jnp.exp(m_prev - m_new)
                         + jnp.sum(jnp.exp(s - m_new), axis=1, keepdims=True))
            m_sc[...] = m_new

        def finalize():
            lse_ref[...] = m_sc[...] + jnp.log(l_sc[...])

        if n_pad_cols > 0:
            # Only the last class tile contains padded columns -> the iota /
            # compare / select masking ops run only there (review item).
            @pl.when(n != num_n - 1)
            def _():
                accumulate(scaled)

            @pl.when(n == num_n - 1)
            def _():
                col = lax.broadcasted_iota(jnp.int32, scaled.shape, 1)
                n_real_in_tile = scaled.shape[1] - n_pad_cols
                accumulate(jnp.where(col < n_real_in_tile, scaled, _NEG_BIG))
                finalize()
        else:
            accumulate(scaled)

            @pl.when(n == num_n - 1)
            def _():
                finalize()

    return kernel


def norm_softmax_loss_w(embeddings, weight, weight_s1, weight_s2,
                        instance_targets, temperature=0.05,
                        block_b=None, block_n=None,
                        logits_dtype=jnp.bfloat16,   # streamed emb / norm_w + logits GEMM operands
                        sigma_dtype=jnp.bfloat16,    # streamed fc / ws2 + sigma GEMM operands
                        out_dtype=jnp.float32,       # emitted logits / w_sigma (bf16 halves writeback)
                        weight_buffers=None):        # e.g. 3 on v5e: deeper buffering of W / ws2
    """NormSoftmaxLoss_W forward. Returns (prediction_logits, w_sigma, loss)."""
    embeddings = embeddings.astype(jnp.float32)
    weight = weight.astype(jnp.float32)
    weight_s1 = weight_s1.astype(jnp.float32)
    weight_s2 = weight_s2.astype(jnp.float32)

    B, D = embeddings.shape
    N = weight.shape[0]
    Dh = weight_s1.shape[0]

    # L2-normalize classifier rows once (rsqrt*w; clamp on the squared norm
    # preserves F.normalize(eps=1e-12) semantics).  Hoisted out of the kernel.
    sumsq = jnp.sum(weight * weight, axis=1, keepdims=True)
    norm_w = weight * lax.rsqrt(jnp.maximum(sumsq, 1e-24))

    # Sigma-head hidden layer hoisted out of the kernel (one XLA GEMM) so ws1
    # never occupies VMEM; fc is streamed per batch tile like the embeddings.
    fc = jnp.maximum(
        lax.dot_general(embeddings.astype(sigma_dtype),
                        weight_s1.astype(sigma_dtype),
                        (((1,), (1,)), ((), ())),
                        preferred_element_type=jnp.float32),
        0.0)

    # Tile sizes: big batch tiles cut weight re-streaming; class tiles are
    # 128-multiples up to 512 (lane-dense stores, 2x256 MXU friendly).
    if block_b is None:
        block_b = min(_round_up(B, 8), 512)
        # Keep >= 2 batch tiles when possible so both v7x TensorCores get work.
        if B > 8 and _round_up(B, block_b) // block_b < 2:
            block_b = max(8, _round_up((B + 1) // 2, 8))
    if block_n is None:
        block_n = min(_round_up(N, 128), 512)
    B_pad = _round_up(B, block_b)
    N_pad = _round_up(N, block_n)
    n_pad_cols = N_pad - N

    def pad2(x, r, c):
        return jnp.pad(x, ((0, r - x.shape[0]), (0, c - x.shape[1])))

    # Cast to the streaming dtypes ONCE in the wrapper (not per grid step).
    emb_p = pad2(embeddings.astype(logits_dtype), B_pad, D)
    w_p = pad2(norm_w.astype(logits_dtype), N_pad, D)
    fc_p = pad2(fc.astype(sigma_dtype), B_pad, Dh)
    ws2_p = pad2(weight_s2.astype(sigma_dtype), N_pad, Dh)

    grid = (B_pad // block_b, N_pad // block_n)
    kernel = _make_kernel(float(1.0 / temperature), n_pad_cols)

    def _wspec(shape, index_map):
        if weight_buffers is None:
            return pl.BlockSpec(shape, index_map)
        return pl.BlockSpec(shape, index_map,
                            pipeline_mode=pl.Buffered(weight_buffers))

    in_specs = [
        pl.BlockSpec((block_b, D), lambda b, n: (b, 0)),       # embeddings
        pl.BlockSpec((block_b, Dh), lambda b, n: (b, 0)),      # relu(emb @ ws1.T)
        _wspec((block_n, D), lambda b, n: (n, 0)),             # normalized W
        _wspec((block_n, Dh), lambda b, n: (n, 0)),            # weight_s2
    ]
    out_specs = (
        pl.BlockSpec((block_b, block_n), lambda b, n: (b, n)),  # logits
        pl.BlockSpec((block_b, block_n), lambda b, n: (b, n)),  # w_sigma
        pl.BlockSpec((block_b, 1), lambda b, n: (b, 0)),        # per-row logsumexp
    )

    # VMEM limit derived from the actual working set (+headroom), capped so it
    # stays portable to v7x's 64 MiB physical VMEM (raise the cap on v5e/v6e).
    wbuf = 2 if weight_buffers is None else weight_buffers
    working = (
        2 * (_nbytes((block_b, D), logits_dtype)
             + _nbytes((block_b, Dh), sigma_dtype)
             + 2 * _nbytes((block_b, block_n), out_dtype)
             + _nbytes((block_b, 1), jnp.float32))
        + wbuf * (_nbytes((block_n, D), logits_dtype)
                  + _nbytes((block_n, Dh), sigma_dtype))
        + 2 * _nbytes((block_b, 1), jnp.float32))
    vmem_limit = min(max(int(working * 1.5) + (4 << 20), 16 << 20), 64 << 20)

    logits_p, wsig_p, lse_p = pl.pallas_call(
        kernel,
        out_shape=(
            jax.ShapeDtypeStruct((B_pad, N_pad), out_dtype),
            jax.ShapeDtypeStruct((B_pad, N_pad), out_dtype),
            jax.ShapeDtypeStruct((B_pad, 1), jnp.float32),
        ),
        grid_spec=pltpu.PrefetchScalarGridSpec(
            num_scalar_prefetch=0,
            grid=grid,
            in_specs=in_specs,
            out_specs=out_specs,
            scratch_shapes=[
                pltpu.VMEM((block_b, 1), jnp.float32),   # running max
                pltpu.VMEM((block_b, 1), jnp.float32),   # running sum(exp)
            ],
        ),
        compiler_params=pltpu.CompilerParams(
            dimension_semantics=("parallel", "arbitrary"),
            vmem_limit_bytes=vmem_limit,
        ),
    )(emb_p, fc_p, w_p, ws2_p)

    prediction_logits = logits_p[:B, :N]
    w_sigma = wsig_p[:B, :N]

    # Target logit gathered from the already-emitted logits in XLA (review item:
    # drops the per-tile target accumulation / iota compare from the hot loop).
    tgt = instance_targets.astype(jnp.int32).reshape(B, 1)
    target_logit = jnp.take_along_axis(prediction_logits.astype(jnp.float32),
                                       tgt, axis=1)
    loss = jnp.mean(lse_p[:B, 0] - target_logit[:, 0] * (1.0 / temperature))
    return prediction_logits, w_sigma, loss


# ----------------------------- references -----------------------------------

def _reference(embeddings, weight, weight_s1, weight_s2, targets, temperature):
    """Exact f32 reference matching the PyTorch forward."""
    norm = jnp.maximum(jnp.linalg.norm(weight, axis=1, keepdims=True), 1e-12)
    norm_w = weight / norm
    logits = embeddings @ norm_w.T
    fc = jnp.maximum(embeddings @ weight_s1.T, 0.0)
    w_sigma = jax.nn.sigmoid(fc @ weight_s2.T)
    scaled = logits / temperature
    logp = scaled - jax.scipy.special.logsumexp(scaled, axis=1, keepdims=True)
    loss = -jnp.mean(jnp.take_along_axis(logp, targets[:, None], axis=1))
    return logits, w_sigma, loss


def _reference_rounded(embeddings, weight, weight_s1, weight_s2, targets,
                       temperature, logits_dtype, sigma_dtype):
    """Reference that emulates the kernel's operand-dtype rounding (bf16 path)."""
    f32 = jnp.float32
    sumsq = jnp.sum(weight * weight, axis=1, keepdims=True)
    norm_w = (weight * lax.rsqrt(jnp.maximum(sumsq, 1e-24)))
    norm_w = norm_w.astype(logits_dtype).astype(f32)
    emb_l = embeddings.astype(logits_dtype).astype(f32)
    logits = emb_l @ norm_w.T
    emb_s = embeddings.astype(sigma_dtype).astype(f32)
    ws1 = weight_s1.astype(sigma_dtype).astype(f32)
    fc = jnp.maximum(emb_s @ ws1.T, 0.0).astype(sigma_dtype).astype(f32)
    ws2 = weight_s2.astype(sigma_dtype).astype(f32)
    w_sigma = jax.nn.sigmoid(fc @ ws2.T)
    scaled = logits / temperature
    logp = scaled - jax.scipy.special.logsumexp(scaled, axis=1, keepdims=True)
    loss = -jnp.mean(jnp.take_along_axis(logp, targets[:, None], axis=1))
    return logits, w_sigma, loss


def _make_inputs(key, B, D, N):
    k_emb, k_w, k_s1, k_s2, k_tgt = jax.random.split(key, 5)
    stdv = 1.0 / math.sqrt(D)
    stdv_s2 = 1.0 / math.sqrt(D // 2)
    weight = jax.random.uniform(k_w, (N, D), jnp.float32, -stdv, stdv)
    weight_s1 = jax.random.uniform(k_s1, (D // 2, D), jnp.float32, -stdv, stdv)
    weight_s2 = jax.random.uniform(k_s2, (N, D // 2), jnp.float32, -stdv_s2, stdv_s2)
    embeddings = jax.random.normal(k_emb, (B, D), jnp.float32)
    instance_targets = jax.random.randint(k_tgt, (B,), 0, N, jnp.int32)
    return embeddings, weight, weight_s1, weight_s2, instance_targets


if __name__ == "__main__":
    temperature = 0.05

    # --- Primary small test: dim=32, num_instances=16, batch=8 -----------------
    B, D, N = 8, 32, 16
    emb, w, ws1, ws2, tgt = _make_inputs(jax.random.PRNGKey(0), B, D, N)

    # (a) full-precision path: tight check against the exact reference.
    logits, w_sigma, loss = norm_softmax_loss_w(
        emb, w, ws1, ws2, tgt, temperature,
        logits_dtype=jnp.float32, sigma_dtype=jnp.float32)
    jax.block_until_ready((logits, w_sigma, loss))
    ref_logits, ref_sigma, ref_loss = _reference(emb, w, ws1, ws2, tgt, temperature)
    assert jnp.allclose(logits, ref_logits, atol=1e-5, rtol=1e-5)
    assert jnp.allclose(w_sigma, ref_sigma, atol=1e-5, rtol=1e-5)
    assert jnp.allclose(loss, ref_loss, atol=1e-4, rtol=1e-4)

    # (b) default fast path (bf16 operand streaming): check against a reference
    #     that applies the same operand rounding.
    logits_b, w_sigma_b, loss_b = norm_softmax_loss_w(emb, w, ws1, ws2, tgt, temperature)
    jax.block_until_ready((logits_b, w_sigma_b, loss_b))
    r_logits, r_sigma, r_loss = _reference_rounded(
        emb, w, ws1, ws2, tgt, temperature, jnp.bfloat16, jnp.bfloat16)
    assert jnp.allclose(logits_b, r_logits, atol=5e-3, rtol=5e-3)
    assert jnp.allclose(w_sigma_b, r_sigma, atol=5e-3, rtol=5e-3)
    assert jnp.allclose(loss_b, r_loss, atol=1e-2, rtol=1e-2)

    # --- Secondary test: multi-tile grid, padding, online-logsumexp across N ----
    B2, D2, N2 = 20, 64, 300
    emb2, w2, ws12, ws22, tgt2 = _make_inputs(jax.random.PRNGKey(1), B2, D2, N2)

    # (a) full-precision path with explicit small tiles (3 batch x 3 class tiles,
    #     padded batch rows + padded class columns on the last tile).
    logits2, w_sigma2, loss2 = norm_softmax_loss_w(
        emb2, w2, ws12, ws22, tgt2, temperature,
        block_b=8, block_n=128,
        logits_dtype=jnp.float32, sigma_dtype=jnp.float32)
    jax.block_until_ready((logits2, w_sigma2, loss2))
    ref_logits2, ref_sigma2, ref_loss2 = _reference(emb2, w2, ws12, ws22, tgt2, temperature)
    assert jnp.allclose(logits2, ref_logits2, atol=1e-4, rtol=1e-4)
    assert jnp.allclose(w_sigma2, ref_sigma2, atol=1e-4, rtol=1e-4)
    assert jnp.allclose(loss2, ref_loss2, atol=1e-3, rtol=1e-3)

    # (b) default fast path on the same shapes (default tiles -> 2 batch tiles).
    logits2b, w_sigma2b, loss2b = norm_softmax_loss_w(
        emb2, w2, ws12, ws22, tgt2, temperature)
    jax.block_until_ready((logits2b, w_sigma2b, loss2b))
    r_logits2, r_sigma2, r_loss2 = _reference_rounded(
        emb2, w2, ws12, ws22, tgt2, temperature, jnp.bfloat16, jnp.bfloat16)
    assert jnp.allclose(logits2b, r_logits2, atol=5e-3, rtol=5e-3)
    assert jnp.allclose(w_sigma2b, r_sigma2, atol=5e-3, rtol=5e-3)
    assert jnp.allclose(loss2b, r_loss2, atol=2e-2, rtol=2e-2)

    print("KERNEL_OK")
</pallas_src>

<mosaic_0001>
module attributes {stable_mosaic.version = 11 : i64} {
  func.func @kernel(%arg0: i32, %arg1: i32, %arg2: memref<8x32xf32, #tpu.memory_space<vmem>>, %arg3: memref<8x16xf32, #tpu.memory_space<vmem>>, %arg4: memref<128x32xf32, #tpu.memory_space<vmem>>, %arg5: memref<128x16xf32, #tpu.memory_space<vmem>>, %arg6: memref<8x128xf32, #tpu.memory_space<vmem>>, %arg7: memref<8x128xf32, #tpu.memory_space<vmem>>, %arg8: memref<8x1xf32, #tpu.memory_space<vmem>>, %arg9: memref<8x1xf32, #tpu.memory_space<vmem>>, %arg10: memref<8x1xf32, #tpu.memory_space<vmem>>) attributes {dimension_semantics = [#tpu.dimension_semantics<parallel>, #tpu.dimension_semantics<arbitrary>], iteration_bounds = array<i64: 1, 1>, scalar_prefetch = 0 : i64, scratch_operands = 2 : i64, tpu.core_type = #tpu.core_type<tc>, window_params = [{transform_indices = @transform_0, window_bounds = array<i64: 8, 32>}, {transform_indices = @transform_1, window_bounds = array<i64: 8, 16>}, {transform_indices = @transform_2, window_bounds = array<i64: 128, 32>}, {transform_indices = @transform_3, window_bounds = array<i64: 128, 16>}, {transform_indices = @transform_4, window_bounds = array<i64: 8, 128>}, {transform_indices = @transform_5, window_bounds = array<i64: 8, 128>}, {transform_indices = @transform_6, window_bounds = array<i64: 8, 1>}]} {
    %c0_i32 = arith.constant 0 : i32
    %0 = arith.cmpi eq, %arg1, %c0_i32 : i32
    %1 = arith.extui %0 : i1 to i32
    %c0_i32_0 = arith.constant 0 : i32
    %2 = arith.cmpi ne, %1, %c0_i32_0 : i32
    scf.if %2 {
      %cst_19 = arith.constant -1.000000e+30 : f32
      %24 = vector.broadcast %cst_19 : f32 to vector<8x1xf32>
      %c0_20 = arith.constant 0 : index
      %c0_21 = arith.constant 0 : index
      %25 = vector.load %arg9[%c0_20, %c0_21] : memref<8x1xf32, #tpu.memory_space<vmem>>, vector<8x1xf32>
      tpu.vector_store %arg9[%c0_20, %c0_21], %24 {strides = array<i32>} : memref<8x1xf32, #tpu.memory_space<vmem>>, vector<8x1xf32>,
      %cst_22 = arith.constant 0.000000e+00 : f32
      %26 = vector.broadcast %cst_22 : f32 to vector<8x1xf32>
      %c0_23 = arith.constant 0 : index
      %c0_24 = arith.constant 0 : index
      %27 = vector.load %arg10[%c0_23, %c0_24] : memref<8x1xf32, #tpu.memory_space<vmem>>, vector<8x1xf32>
      tpu.vector_store %arg10[%c0_23, %c0_24], %26 {strides = array<i32>} : memref<8x1xf32, #tpu.memory_space<vmem>>, vector<8x1xf32>,
    } else {
    }
    %c0 = arith.constant 0 : index
    %c0_1 = arith.constant 0 : index
    %3 = vector.load %arg2[%c0, %c0_1] : memref<8x32xf32, #tpu.memory_space<vmem>>, vector<8x32xf32>
    %c0_2 = arith.constant 0 : index
    %c0_3 = arith.constant 0 : index
    %4 = vector.load %arg4[%c0_2, %c0_3] : memref<128x32xf32, #tpu.memory_space<vmem>>, vector<128x32xf32>
    %cst = arith.constant dense<0.000000e+00> : vector<8x128xf32>
    %5 = tpu.matmul %3, %4, %cst {dimension_numbers = #tpu.dot_dimension_numbers<[1], [1], [0], [0], [0, 0, 1, 0], [], []>} : vector<8x32xf32>, vector<128x32xf32>, vector<8x128xf32> -> vector<8x128xf32>
    %c0_4 = arith.constant 0 : index
    %c0_5 = arith.constant 0 : index
    %6 = vector.load %arg6[%c0_4, %c0_5] : memref<8x128xf32, #tpu.memory_space<vmem>>, vector<8x128xf32>
    tpu.vector_store %arg6[%c0_4, %c0_5], %5 {strides = array<i32>} : memref<8x128xf32, #tpu.memory_space<vmem>>, vector<8x128xf32>,
    %c0_6 = arith.constant 0 : index
    %c0_7 = arith.constant 0 : index
    %7 = vector.load %arg3[%c0_6, %c0_7] : memref<8x16xf32, #tpu.memory_space<vmem>>, vector<8x16xf32>
    %c0_8 = arith.constant 0 : index
    %c0_9 = arith.constant 0 : index
    %8 = vector.load %arg5[%c0_8, %c0_9] : memref<128x16xf32, #tpu.memory_space<vmem>>, vector<128x16xf32>
    %cst_10 = arith.constant dense<0.000000e+00> : vector<8x128xf32>
    %9 = tpu.matmul %7, %8, %cst_10 {dimension_numbers = #tpu.dot_dimension_numbers<[1], [1], [0], [0], [0, 0, 1, 0], [], []>} : vector<8x16xf32>, vector<128x16xf32>, vector<8x128xf32> -> vector<8x128xf32>
    %10 = arith.negf %9 : vector<8x128xf32>
    %11 = math.exp %10 : vector<8x128xf32>
    %cst_11 = arith.constant 1.000000e+00 : f32
    %12 = vector.broadcast %cst_11 : f32 to vector<8x128xf32>
    %13 = arith.addf %12, %11 : vector<8x128xf32>
    %14 = arith.divf %12, %13 : vector<8x128xf32>
    %c0_12 = arith.constant 0 : index
    %c0_13 = arith.constant 0 : index
    %15 = vector.load %arg7[%c0_12, %c0_13] : memref<8x128xf32, #tpu.memory_space<vmem>>, vector<8x128xf32>
    tpu.vector_store %arg7[%c0_12, %c0_13], %14 {strides = array<i32>} : memref<8x128xf32, #tpu.memory_space<vmem>>, vector<8x128xf32>,
    %cst_14 = arith.constant 2.000000e+01 : f32
    %16 = vector.broadcast %cst_14 : f32 to vector<8x128xf32>
    %17 = arith.mulf %5, %16 : vector<8x128xf32>
    %c0_i32_15 = arith.constant 0 : i32
    %18 = arith.cmpi ne, %arg1, %c0_i32_15 : i32
    %19 = arith.extui %18 : i1 to i32
    %c0_i32_16 = arith.constant 0 : i32
    %20 = arith.cmpi ne, %19, %c0_i32_16 : i32
    scf.if %20 {
      %c0_19 = arith.constant 0 : index
      %c0_20 = arith.constant 0 : index
      %24 = vector.load %arg9[%c0_19, %c0_20] : memref<8x1xf32, #tpu.memory_space<vmem>>, vector<8x1xf32>
      %cst_21 = arith.constant dense<0xFF800000> : vector<8xf32>
      %25 = vector.multi_reduction <maximumf>, %17, %cst_21 [1] : vector<8x128xf32> to vector<8xf32>
      %26 = vector.shape_cast %25 : vector<8xf32> to vector<8x1xf32>
      %27 = arith.maximumf %24, %26 : vector<8x1xf32>
      %c0_22 = arith.constant 0 : index
      %c0_23 = arith.constant 0 : index
      %28 = vector.load %arg10[%c0_22, %c0_23] : memref<8x1xf32, #tpu.memory_space<vmem>>, vector<8x1xf32>
      %29 = arith.subf %24, %27 : vector<8x1xf32>
      %30 = math.exp %29 : vector<8x1xf32>
      %31 = arith.mulf %28, %30 : vector<8x1xf32>
      %32 = vector.broadcast %27 : vector<8x1xf32> to vector<8x128xf32>
      %33 = arith.subf %17, %32 : vector<8x128xf32>
      %34 = math.exp %33 : vector<8x128xf32>
      %cst_24 = arith.constant dense<0.000000e+00> : vector<8xf32>
      %35 = vector.multi_reduction <add>, %34, %cst_24 [1] : vector<8x128xf32> to vector<8xf32>
      %36 = vector.shape_cast %35 : vector<8xf32> to vector<8x1xf32>
      %37 = arith.addf %31, %36 : vector<8x1xf32>
      %c0_25 = arith.constant 0 : index
      %c0_26 = arith.constant 0 : index
      %38 = vector.load %arg10[%c0_25, %c0_26] : memref<8x1xf32, #tpu.memory_space<vmem>>, vector<8x1xf32>
      tpu.vector_store %arg10[%c0_25, %c0_26], %37 {strides = array<i32>} : memref<8x1xf32, #tpu.memory_space<vmem>>, vector<8x1xf32>,
      %c0_27 = arith.constant 0 : index
      %c0_28 = arith.constant 0 : index
      %39 = vector.load %arg9[%c0_27, %c0_28] : memref<8x1xf32, #tpu.memory_space<vmem>>, vector<8x1xf32>
      tpu.vector_store %arg9[%c0_27, %c0_28], %27 {strides = array<i32>} : memref<8x1xf32, #tpu.memory_space<vmem>>, vector<8x1xf32>,
    } else {
    }
    %c0_i32_17 = arith.constant 0 : i32
    %21 = arith.cmpi eq, %arg1, %c0_i32_17 : i32
    %22 = arith.extui %21 : i1 to i32
    %c0_i32_18 = arith.constant 0 : i32
    %23 = arith.cmpi ne, %22, %c0_i32_18 : i32
    scf.if %23 {
      %24 = tpu.iota {dimensions = array<i32: 1>} : vector<8x128xi32>
      %c16_i32 = arith.constant 16 : i32
      %25 = vector.broadcast %c16_i32 : i32 to vector<8x128xi32>
      %26 = arith.cmpi slt, %24, %25 : vector<8x128xi32>
      %cst_19 = arith.constant -1.000000e+30 : f32
      %27 = vector.broadcast %cst_19 : f32 to vector<8x128xf32>
      %28 = arith.select %26, %17, %27 : vector<8x128xi1>, vector<8x128xf32>
      %c0_20 = arith.constant 0 : index
      %c0_21 = arith.constant 0 : index
      %29 = vector.load %arg9[%c0_20, %c0_21] : memref<8x1xf32, #tpu.memory_space<vmem>>, vector<8x1xf32>
      %cst_22 = arith.constant dense<0xFF800000> : vector<8xf32>
      %30 = vector.multi_reduction <maximumf>, %28, %cst_22 [1] : vector<8x128xf32> to vector<8xf32>
      %31 = vector.shape_cast %30 : vector<8xf32> to vector<8x1xf32>
      %32 = arith.maximumf %29, %31 : vector<8x1xf32>
      %c0_23 = arith.constant 0 : index
      %c0_24 = arith.constant 0 : index
      %33 = vector.load %arg10[%c0_23, %c0_24] : memref<8x1xf32, #tpu.memory_space<vmem>>, vector<8x1xf32>
      %34 = arith.subf %29, %32 : vector<8x1xf32>
      %35 = math.exp %34 : vector<8x1xf32>
      %36 = arith.mulf %33, %35 : vector<8x1xf32>
      %37 = vector.broadcast %32 : vector<8x1xf32> to vector<8x128xf32>
      %38 = arith.subf %28, %37 : vector<8x128xf32>
      %39 = math.exp %38 : vector<8x128xf32>
      %cst_25 = arith.constant dense<0.000000e+00> : vector<8xf32>
      %40 = vector.multi_reduction <add>, %39, %cst_25 [1] : vector<8x128xf32> to vector<8xf32>
      %41 = vector.shape_cast %40 : vector<8xf32> to vector<8x1xf32>
      %42 = arith.addf %36, %41 : vector<8x1xf32>
      %c0_26 = arith.constant 0 : index
      %c0_27 = arith.constant 0 : index
      %43 = vector.load %arg10[%c0_26, %c0_27] : memref<8x1xf32, #tpu.memory_space<vmem>>, vector<8x1xf32>
      tpu.vector_store %arg10[%c0_26, %c0_27], %42 {strides = array<i32>} : memref<8x1xf32, #tpu.memory_space<vmem>>, vector<8x1xf32>,
      %c0_28 = arith.constant 0 : index
      %c0_29 = arith.constant 0 : index
      %44 = vector.load %arg9[%c0_28, %c0_29] : memref<8x1xf32, #tpu.memory_space<vmem>>, vector<8x1xf32>
      tpu.vector_store %arg9[%c0_28, %c0_29], %32 {strides = array<i32>} : memref<8x1xf32, #tpu.memory_space<vmem>>, vector<8x1xf32>,
      %c0_30 = arith.constant 0 : index
      %c0_31 = arith.constant 0 : index
      %45 = vector.load %arg9[%c0_30, %c0_31] : memref<8x1xf32, #tpu.memory_space<vmem>>, vector<8x1xf32>
      %c0_32 = arith.constant 0 : index
      %c0_33 = arith.constant 0 : index
      %46 = vector.load %arg10[%c0_32, %c0_33] : memref<8x1xf32, #tpu.memory_space<vmem>>, vector<8x1xf32>
      %47 = math.log %46 : vector<8x1xf32>
      %48 = arith.addf %45, %47 : vector<8x1xf32>
      %c0_34 = arith.constant 0 : index
      %c0_35 = arith.constant 0 : index
      %49 = vector.load %arg8[%c0_34, %c0_35] : memref<8x1xf32, #tpu.memory_space<vmem>>, vector<8x1xf32>
      tpu.vector_store %arg8[%c0_34, %c0_35], %48 {strides = array<i32>} : memref<8x1xf32, #tpu.memory_space<vmem>>, vector<8x1xf32>,
    } else {
    }
    return
  }
  func.func @transform_0(%arg0: i32, %arg1: i32) -> (i32, i32) {
    %c0_i32 = arith.constant 0 : i32
    %c0_i32_0 = arith.constant 0 : i32
    return %arg0, %c0_i32 : i32, i32
  }
  func.func @transform_1(%arg0: i32, %arg1: i32) -> (i32, i32) {
    %c0_i32 = arith.constant 0 : i32
    %c0_i32_0 = arith.constant 0 : i32
    return %arg0, %c0_i32 : i32, i32
  }
  func.func @transform_2(%arg0: i32, %arg1: i32) -> (i32, i32) {
    %c0_i32 = arith.constant 0 : i32
    %c0_i32_0 = arith.constant 0 : i32
    return %arg1, %c0_i32 : i32, i32
  }
  func.func @transform_3(%arg0: i32, %arg1: i32) -> (i32, i32) {
    %c0_i32 = arith.constant 0 : i32
    %c0_i32_0 = arith.constant 0 : i32
    return %arg1, %c0_i32 : i32, i32
  }
  func.func @transform_4(%arg0: i32, %arg1: i32) -> (i32, i32) {
    %c0_i32 = arith.constant 0 : i32
    return %arg0, %arg1 : i32, i32
  }
  func.func @transform_5(%arg0: i32, %arg1: i32) -> (i32, i32) {
    %c0_i32 = arith.constant 0 : i32
    return %arg0, %arg1 : i32, i32
  }
  func.func @transform_6(%arg0: i32, %arg1: i32) -> (i32, i32) {
    %c0_i32 = arith.constant 0 : i32
    %c0_i32_0 = arith.constant 0 : i32
    return %arg0, %c0_i32 : i32, i32
  }
}

</mosaic_0001>

<bundles_post_ra>
// kernel: tpu_custom_call.1
= control target key start
LH: loop header
LB: loop body
LE: loop exit
PB: predicated region body
PF: predicated region fallthrough
CT: control target
= control target key end

     0   :  { %12 = vsyncpa [#allocation5], 0  ;;  %vm46_vm0 = vcmask 261120   ;;  %s630_s0 = inlined_call_operand.vmem [shape: f32[8,32], index: 0, kind: input, shape index: {}]   ;;  %s631_s1 = inlined_call_operand.vmem [shape: f32[8,16], index: 1, kind: input, shape index: {}]   ;;  %s632_s2 = inlined_call_operand.vmem [shape: f32[128,32], index: 2, kind: input, shape index: {}]   ;;  %s633_s3 = inlined_call_operand.vmem [shape: f32[128,16], index: 3, kind: input, shape index: {}]   ;;  %s634_s4 = inlined_call_operand.hbm [shape: f32[8,128], index: 4, kind: output, shape index: {0}]   ;;  %s635_s5 = inlined_call_operand.hbm [shape: f32[8,128], index: 5, kind: output, shape index: {1}]   ;;  %s636_s6 = inlined_call_operand.vmem [shape: f32[8,1], index: 6, kind: output, shape index: {2}]  }
   0x1   :  { %v45_v0 = vld [vmem:[%s632_s2 + $0x78] sm:$0xff]  ;;  %v44_v1 = vld [vmem:[%s632_s2 + $0x70] sm:$0xff] }
   0x2   :  { %328 = vmatpush.xpose.msk.msra.mxu0 %vm46_vm0, %v45_v0 }
   0x3   :  { %13 = vsyncpa [#allocation7], 0  ;;  %v43_v2 = vld [vmem:[%s632_s2 + $0x68] sm:$0xff]  ;;  %v42_v3 = vld [vmem:[%s632_s2 + $0x60] sm:$0xff]  ;;  %v259_v17 = vlaneseq  ;;  %vm26_vm2 = vcmask 7168   ;;  %v432_v23 = vmov 0  }
   0x4   :  { %v41_v4 = vld [vmem:[%s632_s2 + $0x58] sm:$0xff]  ;;  %v40_v5 = vld [vmem:[%s632_s2 + $0x50] sm:$0xff]  ;;  %v39_v6 = vld [vmem:[%s632_s2 + $0x48] sm:$0xff]  ;;  %v431_v22 = vmov -1e+30   ;;  %368 = vset.pattern.permute.xlu0 %v432_v23  ;;  %v433_v24 = vmov 0.0  }
   0x5   :  { %v38_v7 = vld [vmem:[%s632_s2 + $0x40] sm:$0xff]  ;;  %v37_v8 = vld [vmem:[%s632_s2 + $0x38] sm:$0xff]  ;;  %v36_v9 = vld [vmem:[%s632_s2 + $0x30] sm:$0xff]  ;;  %v260_v18 = vand.u32 127, %v259_v17  ;;  %27 = vst.msk [vmem:[#allocation2] sm:$0xff] %vm26_vm2, %v431_v22  ;;  %vm136_vm3 = vcmask 130048  }
   0x6   :  { %329 = vmatpush.xpose.msk.msra.mxu0 %vm46_vm0, %v44_v1  ;;  %v35_v10 = vld [vmem:[%s632_s2 + $0x28] sm:$0xff]  ;;  %v34_v11 = vld [vmem:[%s632_s2 + $0x20] sm:$0xff]  ;;  %v33_v12 = vld [vmem:[%s632_s2 + $0x18] sm:$0xff]  ;;  %28 = vst.msk [vmem:[#allocation3] sm:$0xff] %vm26_vm2, %v433_v24  ;;  %s434_s13 = smov [#allocation4]  }
   0x7   :  { %v32_v13 = vld [vmem:[%s632_s2 + $0x10] sm:$0xff]  ;;  %v31_v14 = vld [vmem:[%s632_s2 + $0x8] sm:$0xff]  ;;  %v30_v15 = vld [vmem:[%s632_s2] sm:$0xff]  ;;  %vm261_vm1 = vcmp.lt.s32.totalorder %v260_v18, 16  ;;  %s297_s14 = sshll.u32 %s434_s13, 4  ;;  %s298_s14 = int_to_ptr.vmem [resolvable:$true] %s297_s14 }
   0x8   :  { %v29_v16 = vld [vmem:[%s630_s0] sm:$0xff]  ;;  %v135_v25 = vld [vmem:[%s633_s3 + $0x78] sm:$0xff]  ;;  %v134_v26 = vld [vmem:[%s633_s3 + $0x70] sm:$0xff] }
   0x9   :  { %345 = vmatpush.xpose.msk.msra.mxu1 %vm136_vm3, %v135_v25  ;;  %v133_v27 = vld [vmem:[%s633_s3 + $0x68] sm:$0xff]  ;;  %v132_v28 = vld [vmem:[%s633_s3 + $0x60] sm:$0xff]  ;;  %v131_v29 = vld [vmem:[%s633_s3 + $0x58] sm:$0xff] }
   0xa   :  { %330 = vmatpush.xpose.msk.msra.mxu0 %vm46_vm0, %v43_v2  ;;  %v130_v30 = vld [vmem:[%s633_s3 + $0x50] sm:$0xff]  ;;  %v129_v33 = vld [vmem:[%s633_s3 + $0x48] sm:$0xff]  ;;  %v128_v36 = vld [vmem:[%s633_s3 + $0x40] sm:$0xff] }
   0xb   :  { %v127_v37 = vld [vmem:[%s633_s3 + $0x38] sm:$0xff]  ;;  %v126_v38 = vld [vmem:[%s633_s3 + $0x30] sm:$0xff]  ;;  %v125_v39 = vld [vmem:[%s633_s3 + $0x28] sm:$0xff] }
   0xc   :  { %v564_v31 = vld [vmem:[#allocation2] sm:$0xff]  ;;  %v123_v41 = vld [vmem:[%s633_s3 + $0x18] sm:$0xff]  ;;  %v122_v42 = vld [vmem:[%s633_s3 + $0x10] sm:$0xff] }
   0xd   :  { %346 = vmatpush.xpose.msk.msra.mxu1 %vm136_vm3, %v134_v26  ;;  %v124_v40 = vld [vmem:[%s633_s3 + $0x20] sm:$0xff]  ;;  %v121_v43 = vld [vmem:[%s633_s3 + $0x8] sm:$0xff] }
   0xe   :  { %331 = vmatpush.xpose.msk.msra.mxu0 %vm46_vm0, %v42_v3  ;;  %v120_v44 = vld [vmem:[%s633_s3] sm:$0xff]  ;;  %s299_s3 = sshll.u32 %s634_s4, 4  ;;  %s310_s4 = sshll.u32 %s635_s5, 4  ;;  %v267_v2 = vld [vmem:[#allocation3] sm:$0xff]  ;;  %s300_s3 = int_to_ptr.hbm [resolvable:$true] %s299_s3  ;;  %s311_s4 = int_to_ptr.hbm [resolvable:$true] %s310_s4 }
   0xf   :  { %v119_v45 = vld [vmem:[%s631_s1] sm:$0xff]  ;;  %s435_s1 = smov [#allocation6]  }
  0x10   :  { %s308_s17 = sshll.u32 %s435_s1, 4  ;;  %s309_s17 = int_to_ptr.vmem [resolvable:$true] %s308_s17 }
  0x11   :  { %347 = vmatpush.xpose.msk.msra.mxu1 %vm136_vm3, %v133_v27 }
  0x12   :  { %332 = vmatpush.xpose.msk.msra.mxu0 %vm46_vm0, %v41_v4 }
  0x15   :  { %348 = vmatpush.xpose.msk.msra.mxu1 %vm136_vm3, %v132_v28 }
  0x16   :  { %333 = vmatpush.xpose.msk.msra.mxu0 %vm46_vm0, %v40_v5 }
  0x19   :  { %349 = vmatpush.xpose.msk.msra.mxu1 %vm136_vm3, %v131_v29 }
  0x1a   :  { %334 = vmatpush.xpose.msk.msra.mxu0 %vm46_vm0, %v39_v6 }
  0x1d   :  { %350 = vmatpush.xpose.msk.msra.mxu1 %vm136_vm3, %v130_v30 }
  0x1e   :  { %335 = vmatpush.xpose.msk.msra.mxu0 %vm46_vm0, %v38_v7 }
  0x21   :  { %351 = vmatpush.xpose.msk.msra.mxu1 %vm136_vm3, %v129_v33 }
  0x22   :  { %336 = vmatpush.xpose.msk.msra.mxu0 %vm46_vm0, %v37_v8 }
  0x25   :  { %352 = vmatpush.xpose.msk.msra.mxu1 %vm136_vm3, %v128_v36 }
  0x26   :  { %337 = vmatpush.xpose.msk.msra.mxu0 %vm46_vm0, %v36_v9 }
  0x29   :  { %353 = vmatpush.xpose.msk.msra.mxu1 %vm136_vm3, %v127_v37 }
  0x2a   :  { %338 = vmatpush.xpose.msk.msra.mxu0 %vm46_vm0, %v35_v10 }
  0x2d   :  { %354 = vmatpush.xpose.msk.msra.mxu1 %vm136_vm3, %v126_v38 }
  0x2e   :  { %339 = vmatpush.xpose.msk.msra.mxu0 %vm46_vm0, %v34_v11 }
  0x31   :  { %355 = vmatpush.xpose.msk.msra.mxu1 %vm136_vm3, %v125_v39 }
  0x32   :  { %340 = vmatpush.xpose.msk.msra.mxu0 %vm46_vm0, %v33_v12 }
  0x35   :  { %356 = vmatpush.xpose.msk.msra.mxu1 %vm136_vm3, %v124_v40 }
  0x36   :  { %341 = vmatpush.xpose.msk.msra.mxu0 %vm46_vm0, %v32_v13 }
  0x39   :  { %357 = vmatpush.xpose.msk.msra.mxu1 %vm136_vm3, %v123_v41 }
  0x3a   :  { %342 = vmatpush.xpose.msk.msra.mxu0 %vm46_vm0, %v31_v14 }
  0x3d   :  { %358 = vmatpush.xpose.msk.msra.mxu1 %vm136_vm3, %v122_v42 }
  0x3e   :  { %343 = vmatpush.xpose.msk.msra.mxu0 %vm46_vm0, %v30_v15 }
  0x41   :  { %344 = vmatmul.msk.f32.vlgmr.msra.gmra.mxu0 %vm46_vm0, %v29_v16  ;;  %359 = vmatpush.xpose.msk.msra.mxu1 %vm136_vm3, %v121_v43 }
  0x45   :  { %360 = vmatpush.xpose.msk.msra.mxu1 %vm136_vm3, %v120_v44 }
  0x48   :  { %361 = vmatmul.msk.f32.vlgmr.msra.gmra.mxu1 %vm136_vm3, %v119_v45 }
  0xbe   :  { %v115_v19 = vpop.f32.mrf.mxu0 }
  0xbf   :  { %118 = vst [vmem:[#allocation4] sm:$0xff] %v115_v19  ;;  %v228_v20 = vmul.f32 20.0, %v115_v19 }
  0xc0   :  { %302 = dma.vmem_to_hbm [thread:$0]  %s298_s14, 128, %s300_s3, [#allocation5]  }
  0xc1   :  { %v262_v21 = vsel %vm261_vm1, %v228_v20, -1e+30 }
  0xc2   :  { %264 = vmax.xlane.f32.xlu0 %v262_v21 }
  0xc5   :  { %v205_v50 = vpop.f32.mrf.mxu1 }
  0xc6   :  { %v362_v51 = vmul.f32 -1.442695, %v205_v50 }
 0x135   :  { %v265_v32 = vpop.xlane.xlu0 %264 }
 0x136   :  { %v571_v34 = vmax.f32 %v564_v31, %v265_v32 }
 0x138   :  { %v268_v35 = vsub.f32 %v564_v31, %v571_v34  ;;  %285 = vst.msk [vmem:[#allocation2] sm:$0xff] %vm26_vm2, %v571_v34  ;;  %274 = vperm.xlu0 %368, %v571_v34  }
 0x13a   :  { %v269_v0 = vmul.f32 1.442695, %v268_v35 }
 0x13f   :  { %v286_v9 = vld [vmem:[#allocation2] sm:$0xff] }
 0x1aa   :  { %v275_v46 = vpop.permute.xlu0 %274 }
 0x1ab   :  { %v277_v47 = vsub.f32 %v262_v21, %v275_v46 }
 0x1ad   :  { %v278_v48 = vmul.f32 1.442695, %v277_v47 }
 0x1af   :  { %369 = vpow2.f32 %v278_v48 }
 0x1b0   :  { %371 = vpow2.f32 %v362_v51 }
 0x1b5   :  { %v370_v49 = vpop.eup %369 }
 0x1b6   :  { %280 = vadd.xlane.f32.xlu1 %v370_v49  ;;  %v372_v52 = vpop.eup %371 }
 0x1b7   :  { %v211_v53 = vadd.f32 1.0, %v372_v52 }
 0x1b9   :  { %373 = vrcp.f32 %v211_v53  ;;  %v223_v58 = vand.u32 2147483648, %v211_v53  ;;  %vm217_vm4 = vweird.f32 %v211_v53  ;;  %v221_v60 = vand.u32 2147483647, %v211_v53 }
 0x1ba   :  { %375 = vpow2.f32 %v269_v0 }
 0x1bb   :  { %v224_v61 = vor.u32 1.1754944e-38, %v223_v58  ;;  %vm222_vm7 = vcmp.eq.f32.partialorder %v221_v60, 8.507059e+37 }
 0x1bf   :  { %v374_v54 = vpop.eup %373 }
 0x1c0   :  { %v213_v55 = vmul.f32 %v374_v54, %v211_v53  ;;  %vm218_vm5 = vweird.f32 %v374_v54  ;;  %v376_v1 = vpop.eup %375 }
 0x1c1   :  { %vm219_vm6 = vmor %vm217_vm4, %vm218_vm5  ;;  %v271_v3 = vmul.f32 %v376_v1, %v267_v2 }
 0x1c2   :  { %v214_v56 = vsub.f32 1.0, %v213_v55 }
 0x1c4   :  { %v215_v57 = vmul.f32 %v374_v54, %v214_v56 }
 0x1c6   :  { %v216_v59 = vadd.f32 %v374_v54, %v215_v57 }
 0x1c8   :  { %v220_v62 = vsel %vm219_vm6, %v374_v54, %v216_v59 }
 0x1c9   :  { %v225_v63 = vsel %vm222_vm7, %v224_v61, %v220_v62 }
 0x1ca   :  { %227 = vst [vmem:[#allocation6] sm:$0xff] %v225_v63 }
 0x1cb   :  { %313 = dma.vmem_to_hbm [thread:$0]  %s309_s17, 128, %s311_s4, [#allocation7]  }
 0x229   :  { %v281_v4 = vpop.xlane.xlu1 %280 }
 0x22a   :  { %v282_v5 = vadd.f32 %v281_v4, %v271_v3 }
 0x22c   :  { %284 = vst.msk [vmem:[#allocation3] sm:$0xff] %vm26_vm2, %v282_v5 }
 0x233   :  { %v287_v6 = vld [vmem:[#allocation3] sm:$0xff] }
 0x234   :  { %377 = vlog2.f32 %v287_v6 }
 0x23a   :  { %v378_v7 = vpop.eup %377 }
 0x23b   :  { %v289_v8 = vmul.f32 0.6931472, %v378_v7 }
 0x23d   :  { %v290_v10 = vadd.f32 %v289_v8, %v286_v9 }
 0x23f   :  { %291 = vst.msk [vmem:[%s636_s6] sm:$0xff] %vm26_vm2, %v290_v10 }
 0x240   :  { %427 = dma.done.wait [#allocation5], 128  }
 0x241   :  { %428 = vsyncadd [#allocation5], 4294967168 }
 0x242   :  { %429 = dma.done.wait [#allocation7], 128  }
 0x243   :  { %430 = vsyncadd [#allocation7], 4294967168 }
 0x244   :  { %326 = vsyncpa [#allocation5], 1 }
 0x245   :  { %327 = vsyncpa [#allocation7], 1 }

</bundles_post_ra>
